<compile_context>
chip_gen: v6e
topology: v6e:2x2x1
jax: 0.10.0
libtpu: 0.0.40
codegen_flags: <defaults>
</compile_context>

<pallas_src>
import functools

import jax
import jax.numpy as jnp
from jax import lax
from jax.experimental import pallas as pl
from jax.experimental.pallas import tpu as pltpu


def _cdiv(a, b):
    return -(-a // b)


def _round_up(a, m):
    return _cdiv(a, m) * m


def _choose_batch_tile(B, batch_tile):
    """Lane-count per grid step: multiple of 128, capped near batch_tile."""
    max_bt = max(128, _round_up(batch_tile, 128))
    B128 = _round_up(B, 128)
    if B128 <= max_bt:
        return B128                       # single grid step
    n_steps = _cdiv(B128, max_bt)
    if n_steps % 2 == 1:                  # best-effort even step count (v7x megacore)
        n_steps += 1
    return min(max_bt, _round_up(_cdiv(B128, n_steps), 128))


def _mlp_kernel(x_ref, w_in_ref, b_in_ref, *rest, num_hidden_layers):
    """x_ref: (bt, n_input) [HBM-natural layout]; output: (1, bt) lane-dense."""
    if num_hidden_layers > 0:
        w_hid_ref, b_hid_ref, w_out_ref, b_out_ref, o_ref = rest
    else:
        w_out_ref, b_out_ref, o_ref = rest

    # Upcast right after load (no-op for f32; keeps elementwise/EUP math f32
    # even when x is streamed as bf16 -- required on v5e).
    xb = x_ref[...].astype(jnp.float32)

    # First layer: h = W_in @ x^T + b_in, ReLU.  Contract over n_input so the
    # (bt, n_in) -> (n_in, bt) reorientation happens inside the kernel and the
    # result lands batch-on-lanes:  h: (H, bt).
    h = lax.dot_general(
        w_in_ref[...], xb,
        dimension_numbers=(((1,), (1,)), ((), ())),
        preferred_element_type=jnp.float32)
    h = jnp.maximum(h + b_in_ref[...], 0.0)

    # Hidden layers: MXU chain.  Static unroll for small L; fori_loop for
    # deeper stacks to bound live ranges at large bt.
    if 0 < num_hidden_layers < 4:
        for l in range(num_hidden_layers):
            h = jnp.dot(w_hid_ref[l], h, preferred_element_type=jnp.float32)
            h = jnp.maximum(h + b_hid_ref[l], 0.0)
    elif num_hidden_layers >= 4:
        def body(l, hh):
            hh = jnp.dot(w_hid_ref[l], hh, preferred_element_type=jnp.float32)
            return jnp.maximum(hh + b_hid_ref[l], 0.0)
        h = lax.fori_loop(0, num_hidden_layers, body, h)

    # Output head Linear(H, 1) + Sigmoid as VPU mul + sublane reduce; result
    # (1, bt) is already lane-dense for the store.
    logits = jnp.sum(w_out_ref[...] * h, axis=0, keepdims=True) + b_out_ref[...]
    o_ref[...] = jax.nn.sigmoid(logits).astype(o_ref.dtype)


def surrogate_network_forward(x, params, *, num_hidden_layers, batch_tile=1024,
                              stream_x_bf16=False):
    """SurrogateNetwork forward pass as a fused Pallas TPU kernel.

    x:      (B, n_input) float32
    params: PyTorch layout: w_in (H, n_in), b_in (H, 1), w_hid (L, H, H),
            b_hid (L, H, 1), w_out (H, 1), b_out (1, 1)
    returns (B, 1) float32 in (0, 1)
    """
    B, n_input = x.shape
    H = params["w_in"].shape[0]
    L = num_hidden_layers

    bt = _choose_batch_tile(B, batch_tile)
    grid = (_cdiv(B, bt),)

    if stream_x_bf16:
        x = x.astype(jnp.bfloat16)

    kernel = functools.partial(_mlp_kernel, num_hidden_layers=L)

    in_specs = [
        pl.BlockSpec((bt, n_input), lambda i: (i, 0)),       # x streamed over batch
        pl.BlockSpec((H, n_input), lambda i: (0, 0)),        # w_in (replicated, tiny)
        pl.BlockSpec((H, 1), lambda i: (0, 0)),              # b_in
    ]
    args = [x, params["w_in"], params["b_in"]]
    if L > 0:  # avoid zero-size (0, H, H) blocks when there are no hidden layers
        in_specs += [
            pl.BlockSpec((L, H, H), lambda i: (0, 0, 0)),    # stacked hidden weights
            pl.BlockSpec((L, H, 1), lambda i: (0, 0, 0)),    # stacked hidden biases
        ]
        args += [params["w_hid"], params["b_hid"]]
    in_specs += [
        pl.BlockSpec((H, 1), lambda i: (0, 0)),              # w_out column
        pl.BlockSpec((1, 1), lambda i: (0, 0)),              # b_out
    ]
    args += [params["w_out"], params["b_out"]]

    out_specs = pl.BlockSpec((1, bt), lambda i: (0, i))      # lane-dense output

    weight_bytes = sum(int(params[k].size) * 4
                       for k in ("w_in", "b_in", "w_hid", "b_hid", "w_out", "b_out"))
    cost = pl.CostEstimate(
        flops=2 * B * (n_input * H + L * H * H + H),
        transcendentals=B,                                   # sigmoid
        bytes_accessed=int(x.size) * x.dtype.itemsize + B * 4 + weight_bytes,
    )

    out_t = pl.pallas_call(
        kernel,
        out_shape=jax.ShapeDtypeStruct((1, B), jnp.float32),
        grid_spec=pl.GridSpec(grid=grid, in_specs=in_specs, out_specs=out_specs),
        compiler_params=pltpu.CompilerParams(
            dimension_semantics=("parallel",)),
        cost_estimate=cost,
    )(*args)

    return out_t.reshape(B, 1)


def init_params(key, n_input, hidden_size, num_hidden_layers):
    """Deterministic synthetic parameters (PyTorch-Linear-like uniform init)."""
    H, L = hidden_size, num_hidden_layers
    keys = jax.random.split(key, 2 * (L + 2))

    def linear(kw, kb, fan_in, fan_out):
        bound = 1.0 / jnp.sqrt(jnp.float32(fan_in))
        w = jax.random.uniform(kw, (fan_out, fan_in), jnp.float32, -bound, bound)
        b = jax.random.uniform(kb, (fan_out, 1), jnp.float32, -bound, bound)
        return w, b

    w_in, b_in = linear(keys[0], keys[1], n_input, H)        # (H, n_in), (H, 1)

    w_hid_list, b_hid_list = [], []
    for l in range(L):
        w, b = linear(keys[2 + 2 * l], keys[3 + 2 * l], H, H)
        w_hid_list.append(w)
        b_hid_list.append(b)
    if L > 0:
        w_hid = jnp.stack(w_hid_list, axis=0)                # (L, H, H)
        b_hid = jnp.stack(b_hid_list, axis=0)                # (L, H, 1)
    else:
        w_hid = jnp.zeros((0, H, H), jnp.float32)
        b_hid = jnp.zeros((0, H, 1), jnp.float32)

    w_out_pt, b_out_pt = linear(keys[-2], keys[-1], H, 1)    # (1, H), (1, 1)
    return dict(w_in=w_in, b_in=b_in, w_hid=w_hid, b_hid=b_hid,
                w_out=w_out_pt.T, b_out=b_out_pt)


def reference_forward(x, params, num_hidden_layers):
    """Pure-JAX reference matching nn.Sequential semantics."""
    h = jnp.maximum(x @ params["w_in"].T + params["b_in"][:, 0], 0.0)
    for l in range(num_hidden_layers):
        h = jnp.maximum(h @ params["w_hid"][l].T + params["b_hid"][l, :, 0], 0.0)
    logits = h @ params["w_out"] + params["b_out"][0, 0]
    return jax.nn.sigmoid(logits)


if __name__ == "__main__":
    def check(n_input, hidden_size, L, batch, batch_tile,
              stream_x_bf16=False, tol=2e-5):
        key = jax.random.PRNGKey(0)
        kx, kp = jax.random.split(key)
        x = jax.random.normal(kx, (batch, n_input), dtype=jnp.float32)
        params = init_params(kp, n_input, hidden_size, L)
        out = surrogate_network_forward(
            x, params, num_hidden_layers=L, batch_tile=batch_tile,
            stream_x_bf16=stream_x_bf16)
        out = jax.block_until_ready(out)
        x_ref = x.astype(jnp.bfloat16).astype(jnp.float32) if stream_x_bf16 else x
        ref = reference_forward(x_ref, params, L)
        assert out.shape == (batch, 1)
        assert bool(jnp.all(jnp.isfinite(out)))
        assert jnp.allclose(out, ref, atol=tol, rtol=tol), (
            f"mismatch (n_in={n_input}, H={hidden_size}, L={L}, B={batch})")

    # Main config: SurrogateNetwork(4, 32, 2); B=200 -> one 256-lane grid step
    # with a masked ragged edge (no wrapper-side padding pass).
    check(4, 32, 2, batch=200, batch_tile=1024)
    # Multi-step grid: exercises the parallel batch axis + ragged last block.
    check(4, 32, 2, batch=300, batch_tile=128)
    # No hidden layers (different kernel arg path).
    check(4, 32, 0, batch=64, batch_tile=1024)
    # Deeper stack: exercises the fori_loop hidden-chain path.
    check(4, 32, 4, batch=64, batch_tile=1024)
    # Optional bf16 streaming of x.
    check(4, 32, 2, batch=200, batch_tile=1024, stream_x_bf16=True, tol=2e-4)

    print("KERNEL_OK")
</pallas_src>

<mosaic_0001>
module attributes {stable_mosaic.version = 11 : i64} {
  func.func @_mlp_kernel(%arg0: i32, %arg1: memref<256x4xf32, #tpu.memory_space<vmem>>, %arg2: memref<32x4xf32, #tpu.memory_space<vmem>>, %arg3: memref<32x1xf32, #tpu.memory_space<vmem>>, %arg4: memref<2x32x32xf32, #tpu.memory_space<vmem>>, %arg5: memref<2x32x1xf32, #tpu.memory_space<vmem>>, %arg6: memref<32x1xf32, #tpu.memory_space<vmem>>, %arg7: memref<1x1xf32, #tpu.memory_space<vmem>>, %arg8: memref<1x256xf32, #tpu.memory_space<vmem>>) attributes {dimension_semantics = [#tpu.dimension_semantics<parallel>], iteration_bounds = array<i64: 1>, scalar_prefetch = 0 : i64, scratch_operands = 0 : i64, tpu.core_type = #tpu.core_type<tc>, window_params = [{transform_indices = @transform_0, window_bounds = array<i64: 256, 4>}, {pipeline_mode = #tpu.pipeline_mode<synchronous>, transform_indices = @transform_1, window_bounds = array<i64: 32, 4>}, {pipeline_mode = #tpu.pipeline_mode<synchronous>, transform_indices = @transform_2, window_bounds = array<i64: 32, 1>}, {pipeline_mode = #tpu.pipeline_mode<synchronous>, transform_indices = @transform_3, window_bounds = array<i64: 2, 32, 32>}, {pipeline_mode = #tpu.pipeline_mode<synchronous>, transform_indices = @transform_4, window_bounds = array<i64: 2, 32, 1>}, {pipeline_mode = #tpu.pipeline_mode<synchronous>, transform_indices = @transform_5, window_bounds = array<i64: 32, 1>}, {pipeline_mode = #tpu.pipeline_mode<synchronous>, transform_indices = @transform_6, window_bounds = array<i64: 1, 1>}, {transform_indices = @transform_7, window_bounds = array<i64: 1, 256>}]} {
    %c0 = arith.constant 0 : index
    %c0_0 = arith.constant 0 : index
    %0 = vector.load %arg1[%c0, %c0_0] : memref<256x4xf32, #tpu.memory_space<vmem>>, vector<256x4xf32>
    %c0_1 = arith.constant 0 : index
    %c0_2 = arith.constant 0 : index
    %1 = vector.load %arg2[%c0_1, %c0_2] : memref<32x4xf32, #tpu.memory_space<vmem>>, vector<32x4xf32>
    %cst = arith.constant dense<0.000000e+00> : vector<32x256xf32>
    %2 = tpu.matmul %1, %0, %cst {dimension_numbers = #tpu.dot_dimension_numbers<[1], [1], [0], [0], [0, 0, 1, 0], [], []>} : vector<32x4xf32>, vector<256x4xf32>, vector<32x256xf32> -> vector<32x256xf32>
    %c0_3 = arith.constant 0 : index
    %c0_4 = arith.constant 0 : index
    %3 = vector.load %arg3[%c0_3, %c0_4] : memref<32x1xf32, #tpu.memory_space<vmem>>, vector<32x1xf32>
    %4 = vector.broadcast %3 : vector<32x1xf32> to vector<32x256xf32>
    %5 = arith.addf %2, %4 : vector<32x256xf32>
    %cst_5 = arith.constant 0.000000e+00 : f32
    %6 = vector.broadcast %cst_5 : f32 to vector<32x256xf32>
    %7 = arith.maximumf %5, %6 : vector<32x256xf32>
    %c0_6 = arith.constant 0 : index
    %c0_7 = arith.constant 0 : index
    %c0_8 = arith.constant 0 : index
    %8 = vector.load %arg4[%c0_6, %c0_7, %c0_8] : memref<2x32x32xf32, #tpu.memory_space<vmem>>, vector<1x32x32xf32>
    %9 = vector.shape_cast %8 : vector<1x32x32xf32> to vector<32x32xf32>
    %cst_9 = arith.constant dense<0.000000e+00> : vector<32x256xf32>
    %10 = tpu.matmul %9, %7, %cst_9 {dimension_numbers = #tpu.dot_dimension_numbers<[1], [0], [0], [1], [0, 0, 1, 1], [], []>} : vector<32x32xf32>, vector<32x256xf32>, vector<32x256xf32> -> vector<32x256xf32>
    %c0_10 = arith.constant 0 : index
    %c0_11 = arith.constant 0 : index
    %c0_12 = arith.constant 0 : index
    %11 = vector.load %arg5[%c0_10, %c0_11, %c0_12] : memref<2x32x1xf32, #tpu.memory_space<vmem>>, vector<1x32x1xf32>
    %12 = vector.shape_cast %11 : vector<1x32x1xf32> to vector<32x1xf32>
    %13 = vector.broadcast %12 : vector<32x1xf32> to vector<32x256xf32>
    %14 = arith.addf %10, %13 : vector<32x256xf32>
    %cst_13 = arith.constant 0.000000e+00 : f32
    %15 = vector.broadcast %cst_13 : f32 to vector<32x256xf32>
    %16 = arith.maximumf %14, %15 : vector<32x256xf32>
    %c1 = arith.constant 1 : index
    %c0_14 = arith.constant 0 : index
    %c0_15 = arith.constant 0 : index
    %17 = vector.load %arg4[%c1, %c0_14, %c0_15] : memref<2x32x32xf32, #tpu.memory_space<vmem>>, vector<1x32x32xf32>
    %18 = vector.shape_cast %17 : vector<1x32x32xf32> to vector<32x32xf32>
    %cst_16 = arith.constant dense<0.000000e+00> : vector<32x256xf32>
    %19 = tpu.matmul %18, %16, %cst_16 {dimension_numbers = #tpu.dot_dimension_numbers<[1], [0], [0], [1], [0, 0, 1, 1], [], []>} : vector<32x32xf32>, vector<32x256xf32>, vector<32x256xf32> -> vector<32x256xf32>
    %c1_17 = arith.constant 1 : index
    %c0_18 = arith.constant 0 : index
    %c0_19 = arith.constant 0 : index
    %20 = vector.load %arg5[%c1_17, %c0_18, %c0_19] : memref<2x32x1xf32, #tpu.memory_space<vmem>>, vector<1x32x1xf32>
    %21 = vector.shape_cast %20 : vector<1x32x1xf32> to vector<32x1xf32>
    %22 = vector.broadcast %21 : vector<32x1xf32> to vector<32x256xf32>
    %23 = arith.addf %19, %22 : vector<32x256xf32>
    %cst_20 = arith.constant 0.000000e+00 : f32
    %24 = vector.broadcast %cst_20 : f32 to vector<32x256xf32>
    %25 = arith.maximumf %23, %24 : vector<32x256xf32>
    %c0_21 = arith.constant 0 : index
    %c0_22 = arith.constant 0 : index
    %26 = vector.load %arg6[%c0_21, %c0_22] : memref<32x1xf32, #tpu.memory_space<vmem>>, vector<32x1xf32>
    %27 = vector.broadcast %26 : vector<32x1xf32> to vector<32x256xf32>
    %28 = arith.mulf %27, %25 : vector<32x256xf32>
    %cst_23 = arith.constant dense<0.000000e+00> : vector<256xf32>
    %29 = vector.multi_reduction <add>, %28, %cst_23 [0] : vector<32x256xf32> to vector<256xf32>
    %30 = vector.shape_cast %29 : vector<256xf32> to vector<1x256xf32>
    %c0_24 = arith.constant 0 : index
    %c0_25 = arith.constant 0 : index
    %31 = vector.load %arg7[%c0_24, %c0_25] : memref<1x1xf32, #tpu.memory_space<vmem>>, vector<1x1xf32>
    %32 = vector.broadcast %31 : vector<1x1xf32> to vector<1x256xf32>
    %33 = arith.addf %30, %32 : vector<1x256xf32>
    %34 = arith.negf %33 : vector<1x256xf32>
    %35 = math.exp %34 : vector<1x256xf32>
    %cst_26 = arith.constant 1.000000e+00 : f32
    %36 = vector.broadcast %cst_26 : f32 to vector<1x256xf32>
    %37 = arith.addf %36, %35 : vector<1x256xf32>
    %38 = arith.divf %36, %37 : vector<1x256xf32>
    %c0_27 = arith.constant 0 : index
    %c0_28 = arith.constant 0 : index
    %39 = vector.load %arg8[%c0_27, %c0_28] : memref<1x256xf32, #tpu.memory_space<vmem>>, vector<1x256xf32>
    tpu.vector_store %arg8[%c0_27, %c0_28], %38 {strides = array<i32>} : memref<1x256xf32, #tpu.memory_space<vmem>>, vector<1x256xf32>,
    return
  }
  func.func @transform_0(%arg0: i32) -> (i32, i32) {
    %c0_i32 = arith.constant 0 : i32
    %c0_i32_0 = arith.constant 0 : i32
    return %arg0, %c0_i32 : i32, i32
  }
  func.func @transform_1(%arg0: i32) -> (i32, i32) {
    %c0_i32 = arith.constant 0 : i32
    %c0_i32_0 = arith.constant 0 : i32
    %c0_i32_1 = arith.constant 0 : i32
    return %c0_i32, %c0_i32_0 : i32, i32
  }
  func.func @transform_2(%arg0: i32) -> (i32, i32) {
    %c0_i32 = arith.constant 0 : i32
    %c0_i32_0 = arith.constant 0 : i32
    %c0_i32_1 = arith.constant 0 : i32
    return %c0_i32, %c0_i32_0 : i32, i32
  }
  func.func @transform_3(%arg0: i32) -> (i32, i32, i32) {
    %c0_i32 = arith.constant 0 : i32
    %c0_i32_0 = arith.constant 0 : i32
    %c0_i32_1 = arith.constant 0 : i32
    %c0_i32_2 = arith.constant 0 : i32
    return %c0_i32, %c0_i32_0, %c0_i32_1 : i32, i32, i32
  }
  func.func @transform_4(%arg0: i32) -> (i32, i32, i32) {
    %c0_i32 = arith.constant 0 : i32
    %c0_i32_0 = arith.constant 0 : i32
    %c0_i32_1 = arith.constant 0 : i32
    %c0_i32_2 = arith.constant 0 : i32
    return %c0_i32, %c0_i32_0, %c0_i32_1 : i32, i32, i32
  }
  func.func @transform_5(%arg0: i32) -> (i32, i32) {
    %c0_i32 = arith.constant 0 : i32
    %c0_i32_0 = arith.constant 0 : i32
    %c0_i32_1 = arith.constant 0 : i32
    return %c0_i32, %c0_i32_0 : i32, i32
  }
  func.func @transform_6(%arg0: i32) -> (i32, i32) {
    %c0_i32 = arith.constant 0 : i32
    %c0_i32_0 = arith.constant 0 : i32
    %c0_i32_1 = arith.constant 0 : i32
    return %c0_i32, %c0_i32_0 : i32, i32
  }
  func.func @transform_7(%arg0: i32) -> (i32, i32) {
    %c0_i32 = arith.constant 0 : i32
    %c0_i32_0 = arith.constant 0 : i32
    return %c0_i32, %arg0 : i32, i32
  }
}

</mosaic_0001>

<bundles_post_ra>
// kernel: tpu_custom_call.1
= control target key start
LH: loop header
LB: loop body
LE: loop exit
PB: predicated region body
PF: predicated region fallthrough
CT: control target
= control target key end

     0   :  { %s1103_s0 = inlined_call_operand.vmem [shape: f32[200,4], index: 0, kind: input, shape index: {}]   ;;  %s1104_s1 = inlined_call_operand.vmem [shape: f32[32,4], index: 1, kind: input, shape index: {}]   ;;  %s1105_s2 = inlined_call_operand.vmem [shape: f32[32,1], index: 2, kind: input, shape index: {}]   ;;  %s1106_s3 = inlined_call_operand.vmem [shape: f32[2,32,32], index: 3, kind: input, shape index: {}]   ;;  %s1107_s4 = inlined_call_operand.vmem [shape: f32[2,32,1], index: 4, kind: input, shape index: {}]   ;;  %s1108_s5 = inlined_call_operand.vmem [shape: f32[32,1], index: 5, kind: input, shape index: {}]   ;;  %s1109_s6 = inlined_call_operand.<no memory space> [shape: f32[1,1], index: 6, kind: input, shape index: {}]   ;;  %s1110_s7 = inlined_call_operand.hbm [shape: f32[1,200], index: 7, kind: output, shape index: {}]  }
   0x1   :  { %v12_v0 = vstv %s1109_s6 }
   0x2   :  { %13 = vst [vmem:[#allocation2] sm:$0x1] %v12_v0 }
   0x3   :  { %v60_v1 = vld [vmem:[%s1103_s0 + $0xf8] sm:$0xff]  ;;  %vm89_vm0 = vcmask 31744   ;;  %v59_v3 = vld [vmem:[%s1103_s0 + $0xf0] sm:$0xff]  ;;  %v813_v4 = vmov 0   ;;  %v58_v6 = vld [vmem:[%s1103_s0 + $0xe8] sm:$0xff] }
   0x4   :  { %v44_v2 = vld [vmem:[%s1103_s0 + $0x78] sm:$0xff]  ;;  %737 = vmatprep.subr.msk.mxu0 %vm89_vm0, %v60_v1  ;;  %781 = vset.pattern.permute.xlu0 %v813_v4  ;;  %v43_v5 = vld [vmem:[%s1103_s0 + $0x70] sm:$0xff]  ;;  %v42_v7 = vld [vmem:[%s1103_s0 + $0x68] sm:$0xff] }
   0x5   :  { %738 = vmatpush3.xpose.msk.msra.mxu0 %vm89_vm0, %v44_v2  ;;  %782 = vset.pattern.permute.xlu1 %v813_v4  ;;  %v57_v8 = vld [vmem:[%s1103_s0 + $0xe0] sm:$0xff]  ;;  %v56_v11 = vld [vmem:[%s1103_s0 + $0xd8] sm:$0xff]  ;;  %v66_v13 = vld [vmem:[%s1105_s2 + $0x8] sm:$0xff] }
   0x6   :  { %739 = vmatprep.subr.msk.mxu0 %vm89_vm0, %v59_v3  ;;  %v890_v9 = vld [vmem:[%s1104_s1] sm:$0xff]  ;;  %v68_v12 = vld [vmem:[%s1105_s2 + $0x18] sm:$0xff]  ;;  %v67_v14 = vld [vmem:[%s1105_s2 + $0x10] sm:$0xff]  ;;  %76 = vperm.xlu1 %782, %v66_v13  }
   0x7   :  { %v41_v10 = vld [vmem:[%s1103_s0 + $0x60] sm:$0xff]  ;;  %769 = vmatprep.mubr.msk.f32.mxu0 %vm89_vm0, %v890_v9  ;;  %86 = vperm.xlu0 %781, %v68_v12   ;;  %v40_v15 = vld [vmem:[%s1103_s0 + $0x58] sm:$0xff]  ;;  %v55_v17 = vld [vmem:[%s1103_s0 + $0xd0] sm:$0xff] }
   0x8   :  { %v65_v16 = vld [vmem:[%s1105_s2] sm:$0xff] }
   0x9   :  { %740 = vmatpush3.xpose.msk.msra.mxu0 %vm89_vm0, %v43_v5 }
   0xa   :  { %741 = vmatprep.subr.msk.mxu0 %vm89_vm0, %v58_v6 }
   0xb   :  { %81 = vperm.xlu0 %781, %v67_v14  }
   0xd   :  { %742 = vmatpush3.xpose.msk.msra.mxu0 %vm89_vm0, %v42_v7 }
   0xe   :  { %743 = vmatprep.subr.msk.mxu0 %vm89_vm0, %v57_v8 }
  0x11   :  { %744 = vmatpush3.xpose.msk.msra.mxu0 %vm89_vm0, %v41_v10 }
  0x12   :  { %745 = vmatprep.subr.msk.mxu0 %vm89_vm0, %v56_v11 }
  0x13   :  { %14 = vsyncpa [#allocation4], 0  ;;  %v302_v18 = vld [vmem:[%s1107_s4 + $0x18] sm:$0xff]  ;;  %71 = vperm.xlu1 %782, %v65_v16   ;;  %v39_v19 = vld [vmem:[%s1103_s0 + $0x50] sm:$0xff]  ;;  %v814_v55 = vmov 0.0   ;;  %vm323_vm1 = vcmask 261120  }
  0x14   :  { %v301_v20 = vld [vmem:[%s1107_s4 + $0x10] sm:$0xff]  ;;  %v54_v21 = vld [vmem:[%s1103_s0 + $0xc8] sm:$0xff]  ;;  %320 = vperm.xlu0 %781, %v302_v18   ;;  %v299_v24 = vld [vmem:[%s1107_s4] sm:$0xff]  ;;  %400 = vmatprep.mubr.f32.mxu1 %v814_v55 }
  0x15   :  { %746 = vmatpush3.xpose.msk.msra.mxu0 %vm89_vm0, %v40_v15  ;;  %v300_v22 = vld [vmem:[%s1107_s4 + $0x8] sm:$0xff]  ;;  %v53_v25 = vld [vmem:[%s1103_s0 + $0xc0] sm:$0xff]  ;;  %v52_v29 = vld [vmem:[%s1103_s0 + $0xb8] sm:$0xff] }
  0x16   :  { %747 = vmatprep.subr.msk.mxu0 %vm89_vm0, %v55_v17  ;;  %v38_v23 = vld [vmem:[%s1103_s0 + $0x48] sm:$0xff]  ;;  %v727_v26 = vld [vmem:[%s1107_s4 + $0x20] sm:$0xff]  ;;  %v729_v30 = vld [vmem:[%s1107_s4 + $0x30] sm:$0xff] }
  0x17   :  { %315 = vperm.xlu1 %782, %v301_v20   ;;  %v37_v27 = vld [vmem:[%s1103_s0 + $0x40] sm:$0xff]  ;;  %v728_v28 = vld [vmem:[%s1107_s4 + $0x28] sm:$0xff]  ;;  %v36_v31 = vld [vmem:[%s1103_s0 + $0x38] sm:$0xff] }
  0x18   :  { %310 = vperm.xlu0 %781, %v300_v22   ;;  %v730_v32 = vld [vmem:[%s1107_s4 + $0x38] sm:$0xff]  ;;  %v51_v33 = vld [vmem:[%s1103_s0 + $0xb0] sm:$0xff]  ;;  %v572_v34 = vld [vmem:[%s1108_s5] sm:$0xff] }
  0x19   :  { %748 = vmatpush3.xpose.msk.msra.mxu0 %vm89_vm0, %v39_v19  ;;  %v35_v35 = vld [vmem:[%s1103_s0 + $0x30] sm:$0xff]  ;;  %v573_v36 = vld [vmem:[%s1108_s5 + $0x8] sm:$0xff]  ;;  %v575_v40 = vld [vmem:[%s1108_s5 + $0x18] sm:$0xff] }
  0x1a   :  { %749 = vmatprep.subr.msk.mxu0 %vm89_vm0, %v54_v21  ;;  %v50_v37 = vld [vmem:[%s1103_s0 + $0xa8] sm:$0xff]  ;;  %v574_v38 = vld [vmem:[%s1108_s5 + $0x10] sm:$0xff]  ;;  %v49_v41 = vld [vmem:[%s1103_s0 + $0xa0] sm:$0xff] }
  0x1b   :  { %305 = vperm.xlu1 %782, %v299_v24   ;;  %v34_v39 = vld [vmem:[%s1103_s0 + $0x28] sm:$0xff]  ;;  %v622_v42 = vld [vmem:[#allocation2] sm:$0x1]  ;;  %v48_v44 = vld [vmem:[%s1103_s0 + $0x98] sm:$0xff] }
  0x1c   :  { %445 = vperm.xlu0 %781, %v727_v26   ;;  %v33_v43 = vld [vmem:[%s1103_s0 + $0x20] sm:$0xff]  ;;  %v32_v45 = vld [vmem:[%s1103_s0 + $0x18] sm:$0xff]  ;;  %v47_v46 = vld [vmem:[%s1103_s0 + $0x90] sm:$0xff] }
  0x1d   :  { %750 = vmatpush3.xpose.msk.msra.mxu0 %vm89_vm0, %v38_v23  ;;  %v31_v47 = vld [vmem:[%s1103_s0 + $0x10] sm:$0xff]  ;;  %v46_v48 = vld [vmem:[%s1103_s0 + $0x88] sm:$0xff]  ;;  %v45_v50 = vld [vmem:[%s1103_s0 + $0x80] sm:$0xff] }
  0x1e   :  { %751 = vmatprep.subr.msk.mxu0 %vm89_vm0, %v53_v25  ;;  %v30_v49 = vld [vmem:[%s1103_s0 + $0x8] sm:$0xff]  ;;  %v29_v51 = vld [vmem:[%s1103_s0] sm:$0xff]  ;;  %v63_v53 = vld [vmem:[%s1104_s1 + $0x10] sm:$0xff] }
  0x1f   :  { %450 = vperm.xlu1 %782, %v728_v28   ;;  %v62_v52 = vld [vmem:[%s1104_s1 + $0x8] sm:$0xff]  ;;  %v64_v54 = vld [vmem:[%s1104_s1 + $0x18] sm:$0xff]  ;;  %v295_v20 = vld [vmem:[%s1106_s3] sm:$0xff] }
  0x20   :  { %455 = vperm.xlu0 %781, %v729_v30   ;;  %v296_v21 = vld [vmem:[%s1106_s3 + $0x8] sm:$0xff]  ;;  %v297_v22 = vld [vmem:[%s1106_s3 + $0x10] sm:$0xff]  ;;  %v298_v23 = vld [vmem:[%s1106_s3 + $0x18] sm:$0xff] }
  0x21   :  { %752 = vmatpush3.xpose.msk.msra.mxu0 %vm89_vm0, %v37_v27 }
  0x22   :  { %753 = vmatprep.subr.msk.mxu0 %vm89_vm0, %v52_v29 }
  0x23   :  { %460 = vperm.xlu1 %782, %v730_v32  }
  0x24   :  { %578 = vperm.xlu0 %781, %v572_v34  }
  0x25   :  { %754 = vmatpush3.xpose.msk.msra.mxu0 %vm89_vm0, %v36_v31 }
  0x26   :  { %755 = vmatprep.subr.msk.mxu0 %vm89_vm0, %v51_v33 }
  0x27   :  { %583 = vperm.xlu1 %782, %v573_v36  }
  0x28   :  { %588 = vperm.xlu0 %781, %v574_v38  }
  0x29   :  { %756 = vmatpush3.xpose.msk.msra.mxu0 %vm89_vm0, %v35_v35 }
  0x2a   :  { %757 = vmatprep.subr.msk.mxu0 %vm89_vm0, %v50_v37 }
  0x2b   :  { %593 = vperm.xlu1 %782, %v575_v40  }
  0x2c   :  { %625 = vperm.xlu0 %781, %v622_v42  }
  0x2d   :  { %758 = vmatpush3.xpose.msk.msra.mxu0 %vm89_vm0, %v34_v39 }
  0x2e   :  { %759 = vmatprep.subr.msk.mxu0 %vm89_vm0, %v49_v41 }
  0x31   :  { %760 = vmatpush3.xpose.msk.msra.mxu0 %vm89_vm0, %v33_v43 }
  0x32   :  { %761 = vmatprep.subr.msk.mxu0 %vm89_vm0, %v48_v44 }
  0x35   :  { %762 = vmatpush3.xpose.msk.msra.mxu0 %vm89_vm0, %v32_v45 }
  0x36   :  { %763 = vmatprep.subr.msk.mxu0 %vm89_vm0, %v47_v46 }
  0x39   :  { %764 = vmatpush3.xpose.msk.msra.mxu0 %vm89_vm0, %v31_v47 }
  0x3a   :  { %765 = vmatprep.subr.msk.mxu0 %vm89_vm0, %v46_v48 }
  0x3d   :  { %766 = vmatpush3.xpose.msk.msra.mxu0 %vm89_vm0, %v30_v49 }
  0x3e   :  { %767 = vmatprep.subr.msk.mxu0 %vm89_vm0, %v45_v50 }
  0x41   :  { %768 = vmatpush3.xpose.msk.msra.mxu0 %vm89_vm0, %v29_v51 }
  0x44   :  { %770 = vmatmul.mubr.msk.f32.vlgmr.msra.gmra.mxu0 %vm89_vm0, %v890_v9 }
  0x45   :  { %771 = vmatprep.mubr.msk.f32.mxu0 %vm89_vm0, %v62_v52 }
  0x48   :  { %772 = vmatmul.mubr.msk.f32.gmra.mxu0 %vm89_vm0, %v62_v52  ;;  %v723_v52 = vld [vmem:[%s1106_s3 + $0x20] sm:$0xff] }
  0x49   :  { %773 = vmatprep.mubr.msk.f32.mxu0 %vm89_vm0, %v63_v53 }
  0x4c   :  { %774 = vmatmul.mubr.msk.f32.gmra.mxu0 %vm89_vm0, %v63_v53  ;;  %v724_v53 = vld [vmem:[%s1106_s3 + $0x28] sm:$0xff] }
  0x4d   :  { %775 = vmatprep.mubr.msk.f32.mxu0 %vm89_vm0, %v64_v54 }
  0x50   :  { %776 = vmatmul.mubr.msk.f32.gmra.mxu0 %vm89_vm0, %v64_v54  ;;  %v725_v54 = vld [vmem:[%s1106_s3 + $0x30] sm:$0xff] }
  0x81   :  { %v77_v63 = vpop.permute.xlu1 %76 }
  0x82   :  { %v87_v60 = vpop.permute.xlu0 %86 }
  0x86   :  { %v82_v1 = vpop.permute.xlu0 %81 }
  0x8e   :  { %v72_v9 = vpop.permute.xlu1 %71 }
  0x8f   :  { %v321_v29 = vpop.permute.xlu0 %320 }
  0x92   :  { %v316_v31 = vpop.permute.xlu1 %315 }
  0x93   :  { %v311_v37 = vpop.permute.xlu0 %310 }
  0x96   :  { %v306_v41 = vpop.permute.xlu1 %305 }
 0x104   :  { %v264_v56 = vpop.f32.mrf.mxu0 }
 0x105   :  { %v265_v14 = vadd.f32 %v264_v56, %v72_v9  ;;  %v726_v56 = vld [vmem:[%s1106_s3 + $0x38] sm:$0xff]  ;;  %s816_s3 = smov [#allocation3]  }
 0x106   :  { %v266_v57 = vpop.f32.mrf.mxu0  ;;  %s675_s16 = sshll.u32 %s816_s3, 4  ;;  %s676_s16 = int_to_ptr.vmem [resolvable:$true] %s675_s16 }
 0x107   :  { %v267_v12 = vadd.f32 %v266_v57, %v72_v9  ;;  %v287_v19 = vmax.f32 %v265_v14, 0.0  ;;  %v446_v57 = vpop.permute.xlu0 %445  ;;  %s791_s17 = scalar_lea.vmem %s676_s16, 32  ;;  %p796_p1 = scmp.lt.s32.totalorder %s676_s16, %s676_s16 }
 0x108   :  { %v270_v58 = vpop.f32.mrf.mxu0  ;;  %p792_p0 = scmp.ne.s32.totalorder %s676_s16, %s791_s17  ;;  %p797_p2 = scmp.lt.s32.totalorder %s791_s17, %s791_s17 }
 0x109   :  { %v271_v10 = vadd.f32 %v270_v58, %v77_v63  ;;  %v288_v18 = vmax.f32 %v267_v12, 0.0  ;;  %v451_v58 = vpop.permute.xlu1 %450 }
 0x10a   :  { %v272_v59 = vpop.f32.mrf.mxu0  ;;  %p798_p3 = por %p797_p2, %p796_p1 }
 0x10b   :  { %v273_v7 = vadd.f32 %v272_v59, %v77_v63  ;;  %v289_v17 = vmax.f32 %v271_v10, 0.0  ;;  %v456_v59 = vpop.permute.xlu0 %455 }
 0x10c   :  { %v276_v61 = vpop.f32.mrf.mxu0  ;;  %p799_p4 = pnand %p798_p3, %p792_p0 }
 0x10d   :  { %v277_v6 = vadd.f32 %v276_v61, %v82_v1  ;;  %v290_v16 = vmax.f32 %v273_v7, 0.0 }
 0x10e   :  { %v278_v62 = vpop.f32.mrf.mxu0 }
 0x10f   :  { %v279_v4 = vadd.f32 %v278_v62, %v82_v1  ;;  %v291_v15 = vmax.f32 %v277_v6, 0.0  ;;  %v461_v62 = vpop.permute.xlu1 %460 }
 0x110   :  { %v282_v0 = vpop.f32.mrf.mxu0 }
 0x111   :  { %v283_v2 = vadd.f32 %v282_v0, %v87_v60  ;;  %v292_v13 = vmax.f32 %v279_v4, 0.0 }
 0x112   :  { %v284_v3 = vpop.f32.mrf.mxu0 }
 0x113   :  { %v285_v5 = vadd.f32 %v284_v3, %v87_v60  ;;  %v293_v11 = vmax.f32 %v283_v2, 0.0  ;;  %v579_v2 = vpop.permute.xlu0 %578  ;;  %v584_v10 = vpop.permute.xlu1 %583 }
 0x115   :  { %v294_v8 = vmax.f32 %v285_v5, 0.0 }
 0x117   :  { %360 = vmatprep.subr.mxu1 %v294_v8 }
 0x118   :  { %361 = vmatpush1.msra.mxu1 %v293_v11 }
 0x119   :  { %362 = vmatprep.subr.mxu1 %v292_v13 }
 0x11a   :  { %363 = vmatpush1.msra.mxu1 %v291_v15 }
 0x11b   :  { %364 = vmatprep.subr.mxu1 %v290_v16  ;;  %v589_v16 = vpop.permute.xlu0 %588 }
 0x11c   :  { %365 = vmatpush1.msra.mxu1 %v289_v17 }
 0x11d   :  { %366 = vmatprep.subr.mxu1 %v288_v18 }
 0x11e   :  { %367 = vmatpush1.msra.mxu1 %v287_v19 }
 0x11f   :  { %719 = vmatmul.mubr.msk.f32.vlgmr.msra.gmra.mxu1 %vm323_vm1, %v295_v20 }
 0x120   :  { %406 = vmatprep.mubr.f32.mxu1 %v814_v55 }
 0x123   :  { %720 = vmatmul.mubr.msk.f32.gmra.mxu1 %vm323_vm1, %v296_v21 }
 0x124   :  { %412 = vmatprep.mubr.f32.mxu1 %v814_v55 }
 0x127   :  { %721 = vmatmul.mubr.msk.f32.gmra.mxu1 %vm323_vm1, %v297_v22 }
 0x128   :  { %418 = vmatprep.mubr.f32.mxu1 %v814_v55 }
 0x12b   :  { %722 = vmatmul.mubr.msk.f32.gmra.mxu1 %vm323_vm1, %v298_v23 }
 0x12c   :  { %539 = vmatprep.mubr.f32.mxu1 %v814_v55 }
 0x1df   :  { %v402_v24 = vpop.f32.mrf.mxu1 }
 0x1e0   :  { %v403_v46 = vadd.f32 %v402_v24, %v306_v41 }
 0x1e1   :  { %v404_v25 = vpop.f32.mrf.mxu1 }
 0x1e2   :  { %v405_v44 = vadd.f32 %v404_v25, %v306_v41  ;;  %v425_v51 = vmax.f32 %v403_v46, 0.0 }
 0x1e3   :  { %v408_v26 = vpop.f32.mrf.mxu1 }
 0x1e4   :  { %v409_v42 = vadd.f32 %v408_v26, %v311_v37  ;;  %v426_v50 = vmax.f32 %v405_v44, 0.0 }
 0x1e5   :  { %v410_v27 = vpop.f32.mrf.mxu1 }
 0x1e6   :  { %v411_v39 = vadd.f32 %v410_v27, %v311_v37  ;;  %v427_v49 = vmax.f32 %v409_v42, 0.0 }
 0x1e7   :  { %v414_v28 = vpop.f32.mrf.mxu1 }
 0x1e8   :  { %v415_v38 = vadd.f32 %v414_v28, %v316_v31  ;;  %v428_v48 = vmax.f32 %v411_v39, 0.0 }
 0x1e9   :  { %v416_v30 = vpop.f32.mrf.mxu1 }
 0x1ea   :  { %v417_v35 = vadd.f32 %v416_v30, %v316_v31  ;;  %v429_v47 = vmax.f32 %v415_v38, 0.0 }
 0x1eb   :  { %v420_v32 = vpop.f32.mrf.mxu1 }
 0x1ec   :  { %v421_v33 = vadd.f32 %v420_v32, %v321_v29  ;;  %v430_v45 = vmax.f32 %v417_v35, 0.0 }
 0x1ed   :  { %v422_v34 = vpop.f32.mrf.mxu1 }
 0x1ee   :  { %v423_v36 = vadd.f32 %v422_v34, %v321_v29  ;;  %v431_v43 = vmax.f32 %v421_v33, 0.0  ;;  %v594_v29 = vpop.permute.xlu1 %593  ;;  %v628_v34 = vlaneseq }
 0x1f0   :  { %v432_v40 = vmax.f32 %v423_v36, 0.0  ;;  %vm666_vm2 = vcmp.lt.s32.totalorder %v628_v34, 256 }
 0x1f2   :  { %499 = vmatprep.subr.mxu1 %v432_v40  ;;  %v629_v40 = vshrl.u32 %v628_v34, 7 }
 0x1f3   :  { %500 = vmatpush1.msra.mxu1 %v431_v43 }
 0x1f4   :  { %501 = vmatprep.subr.mxu1 %v430_v45  ;;  %v630_v45 = vsub.s32 0, %v629_v40 }
 0x1f5   :  { %502 = vmatpush1.msra.mxu1 %v429_v47 }
 0x1f6   :  { %503 = vmatprep.subr.mxu1 %v428_v48  ;;  %v626_v48 = vpop.permute.xlu0 %625 }
 0x1f7   :  { %504 = vmatpush1.msra.mxu1 %v427_v49 }
 0x1f8   :  { %505 = vmatprep.subr.mxu1 %v426_v50 }
 0x1f9   :  { %506 = vmatpush1.msra.mxu1 %v425_v51  ;;  %v631_v51 = vrot.slane %v626_v48, %v630_v45 }
 0x1fa   :  { %731 = vmatmul.mubr.msk.f32.vlgmr.msra.gmra.mxu1 %vm323_vm1, %v723_v52 }
 0x1fb   :  { %545 = vmatprep.mubr.f32.mxu1 %v814_v55 }
 0x1fe   :  { %732 = vmatmul.mubr.msk.f32.gmra.mxu1 %vm323_vm1, %v724_v53 }
 0x1ff   :  { %551 = vmatprep.mubr.f32.mxu1 %v814_v55 }
 0x202   :  { %733 = vmatmul.mubr.msk.f32.gmra.mxu1 %vm323_vm1, %v725_v54 }
 0x203   :  { %557 = vmatprep.mubr.f32.mxu1 %v814_v55 }
 0x206   :  { %734 = vmatmul.mubr.msk.f32.gmra.mxu1 %vm323_vm1, %v726_v56 }
 0x2ba   :  { %v541_v60 = vpop.f32.mrf.mxu1 }
 0x2bb   :  { %v542_v63 = vadd.f32 %v541_v60, %v446_v57 }
 0x2bc   :  { %v543_v61 = vpop.f32.mrf.mxu1 }
 0x2bd   :  { %v544_v3 = vadd.f32 %v543_v61, %v446_v57  ;;  %v564_v6 = vmax.f32 %v542_v63, 0.0 }
 0x2be   :  { %v547_v0 = vpop.f32.mrf.mxu1 }
 0x2bf   :  { %v548_v1 = vadd.f32 %v547_v0, %v451_v58  ;;  %v565_v11 = vmax.f32 %v544_v3, 0.0  ;;  %v596_v17 = vmul.f32 %v579_v2, %v564_v6  ;;  %v815_v0 = vmov 1966171168  }
 0x2c0   :  { %v549_v4 = vpop.f32.mrf.mxu1 }
 0x2c1   :  { %v566_v5 = vmax.f32 %v548_v1, 0.0  ;;  %v550_v55 = vadd.f32 %v549_v4, %v451_v58  ;;  %v597_v23 = vmul.f32 %v579_v2, %v565_v11  ;;  %v650_v1 = vunpack.c.l.s4 %v815_v0 }
 0x2c2   :  { %v553_v7 = vpop.f32.mrf.mxu1 }
 0x2c3   :  { %v567_v8 = vmax.f32 %v550_v55, 0.0  ;;  %v554_v9 = vadd.f32 %v553_v7, %v456_v59  ;;  %v598_v13 = vmul.f32 %v584_v10, %v566_v5  ;;  %v651_v2 = vunpack.c.0.s8 %v650_v1 }
 0x2c4   :  { %v555_v12 = vpop.f32.mrf.mxu1 }
 0x2c5   :  { %v568_v14 = vmax.f32 %v554_v9, 0.0  ;;  %v556_v15 = vadd.f32 %v555_v12, %v456_v59  ;;  %v599_v19 = vmul.f32 %v584_v10, %v567_v8  ;;  %v604_v25 = vadd.f32 %v598_v13, %v596_v17 }
 0x2c6   :  { %v559_v18 = vpop.f32.mrf.mxu1  ;;  %v654_v4 = vsub.s32 %v651_v2, %v629_v40 }
 0x2c7   :  { %v600_v20 = vmul.f32 %v589_v16, %v568_v14  ;;  %v569_v21 = vmax.f32 %v556_v15, 0.0  ;;  %v560_v22 = vadd.f32 %v559_v18, %v461_v62  ;;  %v613_v30 = vadd.f32 %v599_v19, %v597_v23 }
 0x2c8   :  { %v561_v24 = vpop.f32.mrf.mxu1 }
 0x2c9   :  { %v601_v26 = vmul.f32 %v589_v16, %v569_v21  ;;  %v570_v27 = vmax.f32 %v560_v22, 0.0  ;;  %v562_v28 = vadd.f32 %v561_v24, %v461_v62  ;;  %v605_v31 = vadd.f32 %v604_v25, %v600_v20 }
 0x2cb   :  { %v602_v32 = vmul.f32 %v594_v29, %v570_v27  ;;  %v571_v33 = vmax.f32 %v562_v28, 0.0  ;;  %v614_v35 = vadd.f32 %v613_v30, %v601_v26 }
 0x2cd   :  { %v606_v36 = vadd.f32 %v605_v31, %v602_v32  ;;  %v603_v37 = vmul.f32 %v594_v29, %v571_v33 }
 0x2cf   :  { %v607_v38 = vrot.slane %v606_v36, 4  ;;  %v615_v39 = vadd.f32 %v614_v35, %v603_v37 }
 0x2d1   :  { %v608_v41 = vadd.f32 %v607_v38, %v606_v36  ;;  %v616_v42 = vrot.slane %v615_v39, 4 }
 0x2d3   :  { %v609_v43 = vrot.slane %v608_v41, 2  ;;  %v617_v44 = vadd.f32 %v616_v42, %v615_v39 }
 0x2d5   :  { %v610_v46 = vadd.f32 %v609_v43, %v608_v41  ;;  %v618_v47 = vrot.slane %v617_v44, 2 }
 0x2d7   :  { %v611_v49 = vrot.slane %v610_v46, 1  ;;  %v619_v50 = vadd.f32 %v618_v47, %v617_v44 }
 0x2d9   :  { %v612_v52 = vadd.f32 %v611_v49, %v610_v46  ;;  %v620_v53 = vrot.slane %v619_v50, 1 }
 0x2db   :  { %v632_v54 = vadd.f32 %v631_v51, %v612_v52  ;;  %v621_v56 = vadd.f32 %v620_v53, %v619_v50 }
 0x2dd   :  { %v735_v57 = vmul.f32 -1.442695, %v632_v54  ;;  %v633_v58 = vadd.f32 %v631_v51, %v621_v56 }
 0x2df   :  { %783 = vpow2.f32 %v735_v57  ;;  %v736_v59 = vmul.f32 -1.442695, %v633_v58 }
 0x2e1   :  { %785 = vpow2.f32 %v736_v59 }
 0x2ec   :  { %v784_v60 = vpop.eup %783 }
 0x2ed   :  { %v640_v61 = vadd.f32 1.0, %v784_v60 }
 0x2ee   :  { %v786_v62 = vpop.eup %785 }
 0x2ef   :  { %v641_v63 = vadd.f32 1.0, %v786_v62  ;;  %787 = vrcp.f32 %v640_v61 }
 0x2f1   :  { %789 = vrcp.f32 %v641_v63 }
 0x2fc   :  { %v788_v3 = vpop.eup %787 }
 0x2fe   :  { %v790_v5 = vpop.eup %789 }
 0x2ff   :  { %v648_v55 = vcombine.low %v788_v3, %v790_v5 }
 0x301   :  { %v655_v6 = vrot.slane %v648_v55, %v654_v4 }
 0x303   :  { %v662_v7 = vrot.slane %v655_v6, %v654_v4 }
 0x305   :  { %668 = vst.msk [vmem:[#allocation3] sm:$0x3] %vm666_vm2, %v662_v7 }
 0x306   :  { %802 = shalt.err (!%p799_p4)
}
 0x307   :  { %678 = dma.vmem_to_hbm [thread:$0]  %s676_s16, 32, %s1110_s7, [#allocation4]  }
 0x308   :  { %811 = dma.done.wait [#allocation4], 32  }
 0x309   :  { %812 = vsyncadd [#allocation4], 4294967264 }
 0x30a   :  { %682 = vsyncpa [#allocation4], 1 }

</bundles_post_ra>
